<compile_context>
chip_gen: v6e
topology: v6e:2x2x1
jax: 0.10.0
libtpu: 0.0.40
codegen_flags: <defaults>
</compile_context>

<pallas_src>
import functools

import jax
import jax.numpy as jnp
from jax.experimental import pallas as pl
from jax.experimental.pallas import tpu as pltpu

C_PAD = 128  # lane-pad the class dimension to a full vreg lane width


def ner_head_kernel(h_ref, w_ref, b_ref, labels_ref,
                    logits_ref, nll_ref, cnt_ref, *, n_tokens):
    """One [TN, H] token tile: classifier linear + per-tile CE partial sums.

    h_ref      : [TN, H]       f32   flattened encoder hidden states (tile)
    w_ref      : [H, C_PAD]    bf16  classifier weight, zero-padded to 128 lanes
    b_ref      : [1, C_PAD]    f32   bias; padded lanes pre-biased to -1e30
    labels_ref : [TN, 1]       i32   labels, -1 = ignore
    logits_ref : [TN, C_PAD]   bf16  output logits (lane-padded; consumer slices :C)
    nll_ref    : [1, 1, C_PAD] f32   per-tile sum of masked NLL (lane-broadcast)
    cnt_ref    : [1, 1, C_PAD] f32   per-tile count of valid labels (lane-broadcast)
    """
    tn = h_ref.shape[0]

    # Dropout: eval-mode identity.
    # TODO(synk): training-mode dropout (pltpu.prng_random_bits mask) not emitted.

    # Cast streamed f32 activations to bf16 in-register right before the MXU
    # (replaces the old host-side pad+cast prepass of h).
    h_bf = h_ref[...].astype(jnp.bfloat16)

    # logits = h @ W^T + b (W stored transposed as [H, C_PAD]). Padded class
    # lanes carry a -1e30 bias from the host, so no lane mask is needed below.
    logits = jnp.dot(h_bf, w_ref[...],
                     preferred_element_type=jnp.float32) + b_ref[...]
    logits_ref[...] = logits.astype(logits_ref.dtype)  # bf16 writeback (half bytes)

    # CrossEntropyLoss(ignore_index=-1): per-tile partial sums only; the mean is
    # taken outside the kernel so the N grid axis stays embarrassingly parallel.
    m = jnp.max(logits, axis=-1, keepdims=True)                       # [TN, 1]
    lse = m + jnp.log(jnp.sum(jnp.exp(logits - m), axis=-1, keepdims=True))

    labels = labels_ref[...]                                          # [TN, 1] i32
    lane = jax.lax.broadcasted_iota(jnp.int32, logits.shape, 1)       # [TN, C_PAD]
    onehot = (lane == labels).astype(jnp.float32)                     # [TN, C_PAD]
    tgt = jnp.sum(logits * onehot, axis=-1, keepdims=True)            # [TN, 1]

    # Ragged last tile: rows past n_tokens hold undefined HBM data; mask them by
    # global row index (no host-side N padding of h or labels).
    row = pl.program_id(0) * tn + jax.lax.broadcasted_iota(jnp.int32, (tn, 1), 0)
    valid = jnp.logical_and(row < n_tokens, labels >= 0)              # [TN, 1]
    nll = jnp.where(valid, lse - tgt, 0.0)   # where (not *) so garbage rows can't NaN

    nll_ref[...] = jnp.zeros_like(nll_ref) + jnp.sum(nll)
    cnt_ref[...] = jnp.zeros_like(cnt_ref) + jnp.sum(valid.astype(jnp.float32))


def ner_head(h_flat, weight, bias, labels_flat, *, num_class):
    """Classifier + CE(ignore_index=-1) over all tokens, tiled along N.

    h_flat      : [N, H] f32   flattened hidden states (streamed as-is, no prepass)
    weight      : [H, C] float classifier weight (transpose of PyTorch [C, H])
    bias        : [C]    float
    labels_flat : [N]    int   (-1 = ignore)
    returns (loss scalar f32, lane-padded bf16 logits [N, C_PAD])
    """
    n, hdim = h_flat.shape
    c = weight.shape[1]
    assert c == num_class

    # TN = 2048 amortizes the ~0.35us/step grid overhead (matters most on v7x at
    # 3.2 TB/s) while double-buffered f32 h tiles (e.g. 6 MiB/buffer at H=768)
    # plus bf16 logits / labels / temporaries stay well under the 32 MiB scoped
    # VMEM limit and v7x's 64 MiB physical VMEM.
    tn = 2048
    if n < tn:
        tn = max(16, ((n + 15) // 16) * 16)  # bf16 output block: (16,128) min tile
    num_tiles = pl.cdiv(n, tn)
    # Note: on v7x the "parallel" grid axis shards across 2 TensorCores; an even
    # num_tiles load-balances best.

    # Only the small classifier operands are materialized host-side; the [N, H]
    # activation is NOT padded or cast (the kernel casts to bf16 in-register).
    w_p = jnp.zeros((hdim, C_PAD), jnp.bfloat16).at[:, :c].set(
        weight.astype(jnp.bfloat16))
    # Pre-bias padded class lanes to -1e30 so no lane mask is needed in-kernel.
    b_p = jnp.full((1, C_PAD), -1e30, jnp.float32).at[0, :c].set(
        bias.reshape(-1).astype(jnp.float32))
    lab = labels_flat.reshape(n, 1).astype(jnp.int32)
    # TODO(synk): [TN,1] i32 label blocks lane-pad to 128 lanes in VMEM
    # (~1 MiB/buffer at TN=2048); accepted per review — a lane-dense relayout
    # would need an in-kernel lane->sublane transpose that isn't worth it.

    kernel = functools.partial(ner_head_kernel, n_tokens=n)
    logits_pad, nll, cnt = pl.pallas_call(
        kernel,
        out_shape=(
            jax.ShapeDtypeStruct((n, C_PAD), jnp.bfloat16),            # lane-padded bf16 logits
            jax.ShapeDtypeStruct((num_tiles, 1, C_PAD), jnp.float32),  # per-tile sum NLL
            jax.ShapeDtypeStruct((num_tiles, 1, C_PAD), jnp.float32),  # per-tile valid count
        ),
        grid=(num_tiles,),
        in_specs=[
            pl.BlockSpec((tn, hdim), lambda i: (i, 0)),     # h tile (f32), pipelined
            # Weight/bias are grid-invariant (constant index_map -> fetched once).
            # Default double-buffering kept for lowering safety; Buffered(1)
            # would only reclaim ~0.4 MiB at H=768.
            pl.BlockSpec((hdim, C_PAD), lambda i: (0, 0)),  # weight, resident
            pl.BlockSpec((1, C_PAD), lambda i: (0, 0)),     # bias, resident
            pl.BlockSpec((tn, 1), lambda i: (i, 0)),        # labels tile
        ],
        out_specs=(
            pl.BlockSpec((tn, C_PAD), lambda i: (i, 0)),
            pl.BlockSpec((1, 1, C_PAD), lambda i: (i, 0, 0)),
            pl.BlockSpec((1, 1, C_PAD), lambda i: (i, 0, 0)),
        ),
        compiler_params=pltpu.CompilerParams(
            dimension_semantics=("parallel",),
            # Explicit limit: required on v5e (16 MiB scoped default), safe on
            # v6e/v7x; leaves headroom under v7x's 64 MiB physical VMEM.
            vmem_limit_bytes=32 * 1024 * 1024,
        ),
    )(h_flat.astype(jnp.float32), w_p, b_p, lab)

    total_nll = jnp.sum(nll[:, 0, 0])
    total_cnt = jnp.sum(cnt[:, 0, 0])
    # Matches torch CrossEntropyLoss(ignore_index=-1, reduction='mean'):
    # if every label is ignored (count == 0) this is NaN, same as PyTorch.
    loss = total_nll / total_cnt
    # Return the lane-padded bf16 logits; the consumer slices [:, :num_class]
    # lazily (avoids another [N,128] HBM round trip here, per perf review).
    return loss, logits_pad


def ner_model_forward(input_ids, attention_mask, labels, params):
    """Mirrors NERModel.forward: h = backbone(...); logits = classifier(dropout(h));
    logits = logits.view(-1, c); loss = CE(logits, labels.view(-1))."""
    # TODO(synk): pretrained HuggingFace AutoModel transformer backbone has no
    # self-contained Pallas equivalent (needs a checkpoint); replaced by a
    # deterministic embedding lookup + attention-mask zeroing (JAX glue).
    emb = params["embedding"]                                          # [V, H]
    h = emb[input_ids] * attention_mask[..., None].astype(emb.dtype)   # [B, S, H]

    b, s, hdim = h.shape
    h_flat = h.reshape(b * s, hdim)          # feeds logits.view(-1, c) flattening
    labels_flat = labels.reshape(b * s)      # labels.view(-1)
    c = params["w"].shape[1]

    loss, logits_pad = ner_head(h_flat, params["w"], params["bias"], labels_flat,
                                num_class=c)
    # logits_pad is bf16 and lane-padded to 128; logits.view(-1, c) of the
    # original module == logits_pad[:, :c], applied lazily at the consumer.
    return loss, logits_pad


if __name__ == "__main__":
    # Small, forward-consistent shapes.
    B, S, H, C, VOCAB = 2, 8, 32, 5, 100

    key = jax.random.PRNGKey(0)
    k_emb, k_w, k_b, k_ids, k_lab = jax.random.split(key, 5)

    params = {
        "embedding": jax.random.normal(k_emb, (VOCAB, H), jnp.float32) * 0.02,
        # classifier: PyTorch nn.Linear(H, C) weight is [C, H]; stored transposed.
        "w": jax.random.normal(k_w, (H, C), jnp.float32) * 0.02,
        "bias": jax.random.normal(k_b, (C,), jnp.float32) * 0.02,
    }

    input_ids = jax.random.randint(k_ids, (B, S), 0, VOCAB, dtype=jnp.int32)
    attention_mask = jnp.ones((B, S), dtype=jnp.int32)
    # labels in [-1, C): -1 entries are ignored by the loss.
    labels = jax.random.randint(k_lab, (B, S), -1, C, dtype=jnp.int32)

    loss, logits_pad = ner_model_forward(input_ids, attention_mask, labels, params)
    jax.block_until_ready((loss, logits_pad))

    # Consumer-side lazy slice of the lane-padded bf16 logits (= logits.view(-1, c)).
    logits = logits_pad[:, :C].astype(jnp.float32)

    # Pure-JAX reference (same bf16 quantization of the matmul operands).
    h = params["embedding"][input_ids] * attention_mask[..., None].astype(jnp.float32)
    h_bf = h.reshape(-1, H).astype(jnp.bfloat16).astype(jnp.float32)
    w_bf = params["w"].astype(jnp.bfloat16).astype(jnp.float32)
    ref_logits = h_bf @ w_bf + params["bias"][None, :]
    lab = labels.reshape(-1)
    lse = jax.nn.logsumexp(ref_logits, axis=-1)
    tgt = jnp.take_along_axis(
        ref_logits, jnp.clip(lab, 0, C - 1)[:, None], axis=-1
    )[:, 0]
    valid = (lab >= 0).astype(jnp.float32)
    ref_loss = jnp.sum((lse - tgt) * valid) / jnp.sum(valid)

    assert logits.shape == (B * S, C)
    # Logits are stored in bf16 (perf review); loss uses the pre-cast f32 logits.
    assert jnp.allclose(logits, ref_logits, atol=5e-3, rtol=5e-2), "logits mismatch"
    assert jnp.allclose(loss, ref_loss, atol=1e-4, rtol=1e-4), "loss mismatch"
    print("KERNEL_OK")
</pallas_src>

<mosaic_0001>
module attributes {stable_mosaic.version = 11 : i64} {
  func.func @ner_head_kernel(%arg0: i32, %arg1: memref<16x32xf32, #tpu.memory_space<vmem>>, %arg2: memref<32x128xbf16, #tpu.memory_space<vmem>>, %arg3: memref<1x128xf32, #tpu.memory_space<vmem>>, %arg4: memref<16x1xi32, #tpu.memory_space<vmem>>, %arg5: memref<16x128xbf16, #tpu.memory_space<vmem>>, %arg6: memref<1x1x128xf32, #tpu.memory_space<vmem>>, %arg7: memref<1x1x128xf32, #tpu.memory_space<vmem>>) attributes {dimension_semantics = [#tpu.dimension_semantics<parallel>], iteration_bounds = array<i64: 1>, scalar_prefetch = 0 : i64, scratch_operands = 0 : i64, tpu.core_type = #tpu.core_type<tc>, window_params = [{transform_indices = @transform_0, window_bounds = array<i64: 16, 32>}, {pipeline_mode = #tpu.pipeline_mode<synchronous>, transform_indices = @transform_1, window_bounds = array<i64: 32, 128>}, {pipeline_mode = #tpu.pipeline_mode<synchronous>, transform_indices = @transform_2, window_bounds = array<i64: 1, 128>}, {transform_indices = @transform_3, window_bounds = array<i64: 16, 1>}, {transform_indices = @transform_4, window_bounds = array<i64: 16, 128>}, {transform_indices = @transform_5, window_bounds = array<i64: 1, 1, 128>}, {transform_indices = @transform_6, window_bounds = array<i64: 1, 1, 128>}]} {
    %c0 = arith.constant 0 : index
    %c0_0 = arith.constant 0 : index
    %0 = vector.load %arg1[%c0, %c0_0] : memref<16x32xf32, #tpu.memory_space<vmem>>, vector<16x32xf32>
    %1 = arith.truncf %0 : vector<16x32xf32> to vector<16x32xbf16>
    %c0_1 = arith.constant 0 : index
    %c0_2 = arith.constant 0 : index
    %2 = vector.load %arg2[%c0_1, %c0_2] : memref<32x128xbf16, #tpu.memory_space<vmem>>, vector<32x128xbf16>
    %cst = arith.constant dense<0.000000e+00> : vector<16x128xf32>
    %3 = tpu.matmul %1, %2, %cst {dimension_numbers = #tpu.dot_dimension_numbers<[1], [0], [0], [1], [0, 0, 1, 1], [], []>} : vector<16x32xbf16>, vector<32x128xbf16>, vector<16x128xf32> -> vector<16x128xf32>
    %c0_3 = arith.constant 0 : index
    %c0_4 = arith.constant 0 : index
    %4 = vector.load %arg3[%c0_3, %c0_4] : memref<1x128xf32, #tpu.memory_space<vmem>>, vector<1x128xf32>
    %5 = vector.broadcast %4 : vector<1x128xf32> to vector<16x128xf32>
    %6 = arith.addf %3, %5 : vector<16x128xf32>
    %7 = arith.truncf %6 : vector<16x128xf32> to vector<16x128xbf16>
    %c0_5 = arith.constant 0 : index
    %c0_6 = arith.constant 0 : index
    %8 = vector.load %arg5[%c0_5, %c0_6] : memref<16x128xbf16, #tpu.memory_space<vmem>>, vector<16x128xbf16>
    tpu.vector_store %arg5[%c0_5, %c0_6], %7 {strides = array<i32>} : memref<16x128xbf16, #tpu.memory_space<vmem>>, vector<16x128xbf16>,
    %cst_7 = arith.constant dense<0xFF800000> : vector<16xf32>
    %9 = vector.multi_reduction <maximumf>, %6, %cst_7 [1] : vector<16x128xf32> to vector<16xf32>
    %10 = vector.shape_cast %9 : vector<16xf32> to vector<16x1xf32>
    %11 = vector.broadcast %10 : vector<16x1xf32> to vector<16x128xf32>
    %12 = arith.subf %6, %11 : vector<16x128xf32>
    %13 = math.exp %12 : vector<16x128xf32>
    %cst_8 = arith.constant dense<0.000000e+00> : vector<16xf32>
    %14 = vector.multi_reduction <add>, %13, %cst_8 [1] : vector<16x128xf32> to vector<16xf32>
    %15 = vector.shape_cast %14 : vector<16xf32> to vector<16x1xf32>
    %16 = math.log %15 : vector<16x1xf32>
    %17 = arith.addf %10, %16 : vector<16x1xf32>
    %c0_9 = arith.constant 0 : index
    %c0_10 = arith.constant 0 : index
    %18 = vector.load %arg4[%c0_9, %c0_10] : memref<16x1xi32, #tpu.memory_space<vmem>>, vector<16x1xi32>
    %19 = tpu.iota {dimensions = array<i32: 1>} : vector<16x128xi32>
    %20 = vector.broadcast %18 : vector<16x1xi32> to vector<16x128xi32>
    %21 = arith.cmpi eq, %19, %20 : vector<16x128xi32>
    %22 = arith.extui %21 : vector<16x128xi1> to vector<16x128xi32>
    %23 = arith.sitofp %22 : vector<16x128xi32> to vector<16x128xf32>
    %24 = arith.mulf %6, %23 : vector<16x128xf32>
    %cst_11 = arith.constant dense<0.000000e+00> : vector<16xf32>
    %25 = vector.multi_reduction <add>, %24, %cst_11 [1] : vector<16x128xf32> to vector<16xf32>
    %26 = vector.shape_cast %25 : vector<16xf32> to vector<16x1xf32>
    %c16_i32 = arith.constant 16 : i32
    %27 = arith.muli %arg0, %c16_i32 : i32
    %28 = tpu.iota {dimensions = array<i32: 0>} : vector<16x1xi32>
    %29 = vector.broadcast %27 : i32 to vector<16x1xi32>
    %30 = arith.addi %29, %28 : vector<16x1xi32>
    %c16_i32_12 = arith.constant 16 : i32
    %31 = vector.broadcast %c16_i32_12 : i32 to vector<16x1xi32>
    %32 = arith.cmpi slt, %30, %31 : vector<16x1xi32>
    %c0_i32 = arith.constant 0 : i32
    %33 = vector.broadcast %c0_i32 : i32 to vector<16x1xi32>
    %34 = arith.cmpi sge, %18, %33 : vector<16x1xi32>
    %35 = arith.andi %32, %34 : vector<16x1xi1>
    %36 = arith.subf %17, %26 : vector<16x1xf32>
    %cst_13 = arith.constant 0.000000e+00 : f32
    %37 = vector.broadcast %cst_13 : f32 to vector<16x1xf32>
    %38 = arith.select %35, %36, %37 : vector<16x1xi1>, vector<16x1xf32>
    %cst_14 = arith.constant 0.000000e+00 : f32
    %39 = vector.broadcast %cst_14 : f32 to vector<1x1x128xf32>
    %40 = vector.shape_cast %38 : vector<16x1xf32> to vector<1x16x1xf32>
    %cst_15 = arith.constant dense<0.000000e+00> : vector<1xf32>
    %41 = vector.multi_reduction <add>, %40, %cst_15 [1, 2] : vector<1x16x1xf32> to vector<1xf32>
    %42 = vector.shape_cast %41 : vector<1xf32> to vector<1x1x1xf32>
    %43 = vector.extract %42[0, 0, 0] : f32 from vector<1x1x1xf32>
    %44 = vector.broadcast %43 : f32 to vector<1x1x128xf32>
    %45 = arith.addf %39, %44 : vector<1x1x128xf32>
    %c0_16 = arith.constant 0 : index
    %c0_17 = arith.constant 0 : index
    %c0_18 = arith.constant 0 : index
    %46 = vector.load %arg6[%c0_16, %c0_17, %c0_18] : memref<1x1x128xf32, #tpu.memory_space<vmem>>, vector<1x1x128xf32>
    tpu.vector_store %arg6[%c0_16, %c0_17, %c0_18], %45 {strides = array<i32>} : memref<1x1x128xf32, #tpu.memory_space<vmem>>, vector<1x1x128xf32>,
    %cst_19 = arith.constant 0.000000e+00 : f32
    %47 = vector.broadcast %cst_19 : f32 to vector<1x1x128xf32>
    %48 = arith.extui %35 : vector<16x1xi1> to vector<16x1xi32>
    %49 = arith.sitofp %48 : vector<16x1xi32> to vector<16x1xf32>
    %50 = vector.shape_cast %49 : vector<16x1xf32> to vector<1x16x1xf32>
    %cst_20 = arith.constant dense<0.000000e+00> : vector<1xf32>
    %51 = vector.multi_reduction <add>, %50, %cst_20 [1, 2] : vector<1x16x1xf32> to vector<1xf32>
    %52 = vector.shape_cast %51 : vector<1xf32> to vector<1x1x1xf32>
    %53 = vector.extract %52[0, 0, 0] : f32 from vector<1x1x1xf32>
    %54 = vector.broadcast %53 : f32 to vector<1x1x128xf32>
    %55 = arith.addf %47, %54 : vector<1x1x128xf32>
    %c0_21 = arith.constant 0 : index
    %c0_22 = arith.constant 0 : index
    %c0_23 = arith.constant 0 : index
    %56 = vector.load %arg7[%c0_21, %c0_22, %c0_23] : memref<1x1x128xf32, #tpu.memory_space<vmem>>, vector<1x1x128xf32>
    tpu.vector_store %arg7[%c0_21, %c0_22, %c0_23], %55 {strides = array<i32>} : memref<1x1x128xf32, #tpu.memory_space<vmem>>, vector<1x1x128xf32>,
    return
  }
  func.func @transform_0(%arg0: i32) -> (i32, i32) {
    %c0_i32 = arith.constant 0 : i32
    %c0_i32_0 = arith.constant 0 : i32
    return %arg0, %c0_i32 : i32, i32
  }
  func.func @transform_1(%arg0: i32) -> (i32, i32) {
    %c0_i32 = arith.constant 0 : i32
    %c0_i32_0 = arith.constant 0 : i32
    %c0_i32_1 = arith.constant 0 : i32
    return %c0_i32, %c0_i32_0 : i32, i32
  }
  func.func @transform_2(%arg0: i32) -> (i32, i32) {
    %c0_i32 = arith.constant 0 : i32
    %c0_i32_0 = arith.constant 0 : i32
    %c0_i32_1 = arith.constant 0 : i32
    return %c0_i32, %c0_i32_0 : i32, i32
  }
  func.func @transform_3(%arg0: i32) -> (i32, i32) {
    %c0_i32 = arith.constant 0 : i32
    %c0_i32_0 = arith.constant 0 : i32
    return %arg0, %c0_i32 : i32, i32
  }
  func.func @transform_4(%arg0: i32) -> (i32, i32) {
    %c0_i32 = arith.constant 0 : i32
    %c0_i32_0 = arith.constant 0 : i32
    return %arg0, %c0_i32 : i32, i32
  }
  func.func @transform_5(%arg0: i32) -> (i32, i32, i32) {
    %c0_i32 = arith.constant 0 : i32
    %c0_i32_0 = arith.constant 0 : i32
    %c0_i32_1 = arith.constant 0 : i32
    return %arg0, %c0_i32, %c0_i32_0 : i32, i32, i32
  }
  func.func @transform_6(%arg0: i32) -> (i32, i32, i32) {
    %c0_i32 = arith.constant 0 : i32
    %c0_i32_0 = arith.constant 0 : i32
    %c0_i32_1 = arith.constant 0 : i32
    return %arg0, %c0_i32, %c0_i32_0 : i32, i32, i32
  }
}

</mosaic_0001>

<bundles_post_ra>
// kernel: tpu_custom_call.1
= control target key start
LH: loop header
LB: loop body
LE: loop exit
PB: predicated region body
PF: predicated region fallthrough
CT: control target
= control target key end

     0   :  { %12 = vsyncpa [#allocation3], 0  ;;  %s492_s0 = inlined_call_operand.vmem [shape: f32[16,32], index: 0, kind: input, shape index: {}]   ;;  %s493_s1 = inlined_call_operand.hbm [shape: bf16[32,128], index: 1, kind: input, shape index: {}]   ;;  %s494_s2 = inlined_call_operand.vmem [shape: f32[1,128], index: 2, kind: input, shape index: {}]   ;;  %s495_s3 = inlined_call_operand.vmem [shape: s32[16,1], index: 3, kind: input, shape index: {}]   ;;  %s496_s4 = inlined_call_operand.hbm [shape: bf16[16,128], index: 4, kind: output, shape index: {0}]   ;;  %s497_s5 = inlined_call_operand.hbm [shape: f32[1,1,128], index: 5, kind: output, shape index: {1}]   ;;  %s498_s6 = inlined_call_operand.hbm [shape: f32[1,1,128], index: 6, kind: output, shape index: {2}]  }
   0x1   :  { %13 = vsyncpa [#allocation4], 0 }
   0x2   :  { %14 = vsyncpa [#allocation7], 0  ;;  %s395_s21 = smov [#allocation2]  }
   0x3   :  { %s22_s22 = sshll.u32 %s395_s21, 4  ;;  %s23_s22 = int_to_ptr.vmem [resolvable:$true] %s22_s22 }
   0x4   :  { %s317_s23 = scalar_lea.vmem %s23_s22, 256  ;;  %p322_p1 = scmp.lt.s32.totalorder %s23_s22, %s23_s22 }
   0x5   :  { %p318_p0 = scmp.ne.s32.totalorder %s23_s22, %s317_s23  ;;  %p323_p2 = scmp.lt.s32.totalorder %s317_s23, %s317_s23 }
   0x7   :  { %p324_p3 = por %p323_p2, %p322_p1 }
   0x9   :  { %p325_p4 = pnand %p324_p3, %p318_p0 }
   0xb   :  { %328 = shalt.err (!%p325_p4)
}
   0xc   :  { %s396_s24 = smov 64   ;;  %s397_s25 = smov 4  }
   0xd   :  { %28 = dma.hbm_to_vmem [thread:$0]  %s493_s1, 256, %s23_s22, [#allocation3], %s396_s24, %s396_s24, %s397_s25  }
   0xe   :  { %389 = dma.done.wait [#allocation3], 256  }
   0xf   :  { %390 = vsyncadd [#allocation3], 4294967040  ;;  %v398_v0 = vmov 0.0   ;;  %vm399_vm0 = vmmov 0   ;;  %v400_v1 = vmov 0   ;;  %v299_v2 = vld [vmem:[#allocation2 + $0x8] sm:$0xff]   ;;  %v140_v22 = vlaneseq }
  0x10   :  { %276 = vmatprep.subr.bf16.mxu0 %v398_v0  ;;  %280 = vmatprep.mubr.msk.bf16.mxu0 %vm399_vm0, %v398_v0  ;;  %v300_v3 = vld [vmem:[#allocation2] sm:$0xff]   ;;  %v38_v5 = vld [vmem:[%s492_s0 + $0x8] sm:$0xff]  ;;  %vm63_vm1 = vcmask 261120   ;;  %vm177_vm6 = vcmask 7168  }
  0x11   :  { %297 = vset.pattern.permute.xlu1 %v400_v1  ;;  %298 = vset.pattern.permute.xlu0 %v400_v1  ;;  %v37_v4 = vld [vmem:[%s492_s0] sm:$0xff]  ;;  %v460_v7 = vld [vmem:[%s495_s3 + $0x8] sm:$0xff]  ;;  %v141_v25 = vand.u32 127, %v140_v22 }
  0x12   :  { %277 = vmatpush3.bf16.msra.mxu0 %v299_v2  ;;  %v454_v6 = vld [vmem:[%s495_s3] sm:$0xff]  ;;  %v39_v8 = vpack.c.bf16 %v38_v5, %v37_v4  ;;  %vm170_vm5 = vcmp.ge.s32.totalorder %v460_v7, 0 }
  0x13   :  { %278 = vmatprep.subr.bf16.mxu0 %v398_v0  ;;  %143 = vperm.xlu1 %297, %v454_v6   ;;  %v256_v9 = vld [vmem:[%s494_s2] ss:$0 sm:$0xff]  ;;  %vm169_vm4 = vcmp.ge.s32.totalorder %v454_v6, 0  ;;  %v265_v34 = vsel %vm170_vm5, 1.0, %v398_v0  ;;  %s401_s2 = smov [#allocation5]  }
  0x14   :  { %v264_v33 = vsel %vm169_vm4, 1.0, %v398_v0  ;;  %v198_v36 = vsel %vm177_vm6, %v265_v34, 0.0  ;;  %s217_s3 = sshll.u32 %s401_s2, 4  ;;  %s218_s3 = int_to_ptr.vmem [resolvable:$true] %s217_s3 }
  0x15   :  { %v197_v35 = vsel %vm177_vm6, %v264_v33, 0.0  ;;  %s329_s12 = scalar_lea.vmem %s218_s3, 128  ;;  %p334_p6 = scmp.lt.s32.totalorder %s218_s3, %s218_s3 }
  0x16   :  { %279 = vmatpush3.bf16.msra.mxu0 %v300_v3  ;;  %v199_v37 = vadd.f32 %v198_v36, %v197_v35  ;;  %p330_p5 = scmp.ne.s32.totalorder %s218_s3, %s329_s12  ;;  %p335_p7 = scmp.lt.s32.totalorder %s329_s12, %s329_s12 }
  0x17   :  { %146 = vperm.xlu1 %297, %v460_v7  }
  0x18   :  { %p336_p8 = por %p335_p7, %p334_p6 }
  0x19   :  { %281 = vmatmul.mubr.msk.bf16.vlgmr.msra.gmra.mxu0 %vm63_vm1, %v39_v8 }
  0x1a   :  { %p337_p9 = pnand %p336_p8, %p330_p5 }
  0x8e   :  { %v144_v24 = vpop.permute.xlu1 %143 }
  0x8f   :  { %vm148_vm2 = vcmp.eq.s32.totalorder %v141_v25, %v144_v24 }
  0x90   :  { %v262_v28 = vsel %vm148_vm2, 1.0, %v398_v0 }
  0x92   :  { %v147_v26 = vpop.permute.xlu1 %146 }
  0x93   :  { %vm149_vm3 = vcmp.eq.s32.totalorder %v141_v25, %v147_v26 }
  0x94   :  { %v263_v31 = vsel %vm149_vm3, 1.0, %v398_v0 }
  0xd9   :  { %v101_v10 = vpop.f32.mrf.mxu0 }
  0xda   :  { %v102_v11 = vadd.f32 %v256_v9, %v101_v10 }
  0xdb   :  { %v282_v12 = vpop.f32.mrf.mxu0 }
  0xdc   :  { %118 = vmax.xlane.f32.xlu0 %v102_v11  ;;  %v154_v29 = vmul.f32 %v262_v28, %v102_v11 }
  0xdd   :  { %v104_v13 = vpop.f32.mrf.mxu0 }
  0xde   :  { %v105_v14 = vadd.f32 %v256_v9, %v104_v13 }
  0xdf   :  { %v283_v15 = vpop.f32.mrf.mxu0 }
  0xe0   :  { %120 = vmax.xlane.f32.xlu0 %v105_v14  ;;  %v271_v16 = vpack.c.bf16 %v105_v14, %v102_v11  ;;  %v155_v32 = vmul.f32 %v263_v31, %v105_v14 }
  0xe2   :  { %272 = vst [vmem:[#allocation5] sm:$0xff] %v271_v16  }
 0x165   :  { %v119_v17 = vpop.xlane.xlu0 %118 }
 0x166   :  { %v122_v18 = vsub.f32 %v102_v11, %v119_v17 }
 0x168   :  { %v124_v19 = vmul.f32 1.442695, %v122_v18 }
 0x169   :  { %v121_v20 = vpop.xlane.xlu0 %120 }
 0x16a   :  { %301 = vpow2.f32 %v124_v19  ;;  %v123_v21 = vsub.f32 %v105_v14, %v121_v20 }
 0x16c   :  { %v126_v23 = vmul.f32 1.442695, %v123_v21 }
 0x16e   :  { %303 = vpow2.f32 %v126_v23 }
 0x177   :  { %v302_v27 = vpop.eup %301 }
 0x178   :  { %128 = vadd.xlane.f32.xlu0 %v302_v27 }
 0x17b   :  { %v304_v30 = vpop.eup %303 }
 0x17c   :  { %156 = vadd.xlane.f32.xlu0 %v154_v29  ;;  %130 = vadd.xlane.f32.xlu1 %v304_v30 }
 0x180   :  { %158 = vadd.xlane.f32.xlu0 %v155_v32 }
 0x201   :  { %v129_v38 = vpop.xlane.xlu0 %128 }
 0x202   :  { %305 = vlog2.f32 %v129_v38 }
 0x205   :  { %v131_v39 = vpop.xlane.xlu1 %130  ;;  %v157_v42 = vpop.xlane.xlu0 %156 }
 0x206   :  { %307 = vlog2.f32 %v131_v39 }
 0x209   :  { %v159_v48 = vpop.xlane.xlu0 %158 }
 0x20f   :  { %v306_v40 = vpop.eup %305 }
 0x210   :  { %v133_v41 = vmul.f32 0.6931472, %v306_v40 }
 0x212   :  { %v136_v43 = vadd.f32 %v133_v41, %v119_v17 }
 0x213   :  { %v308_v44 = vpop.eup %307 }
 0x214   :  { %v135_v45 = vmul.f32 0.6931472, %v308_v44  ;;  %v173_v46 = vsub.f32 %v136_v43, %v157_v42 }
 0x216   :  { %v137_v47 = vadd.f32 %v135_v45, %v121_v20  ;;  %v175_v49 = vsel %vm169_vm4, %v173_v46, 0.0 }
 0x217   :  { %v178_v52 = vsel %vm177_vm6, %v175_v49, 0.0 }
 0x218   :  { %v174_v50 = vsub.f32 %v137_v47, %v159_v48 }
 0x21a   :  { %v176_v51 = vsel %vm170_vm5, %v174_v50, 0.0 }
 0x21b   :  { %v179_v53 = vsel %vm177_vm6, %v176_v51, 0.0 }
 0x21c   :  { %v180_v54 = vadd.f32 %v179_v53, %v178_v52 }
 0x21e   :  { %181 = vadd.xlane.f32.xlu0 %v180_v54 }
 0x222   :  { %200 = vadd.xlane.f32.xlu0 %v199_v37 }
 0x223   :  { %340 = shalt.err (!%p337_p9)
}
 0x224   :  { %223 = dma.vmem_to_hbm [thread:$0]  %s218_s3, 128, %s496_s4, [#allocation4], %s396_s24, %s396_s24, %s397_s25  }
 0x225   :  { %s402_s15 = smov [#allocation6]   ;;  %s403_s4 = smov [#allocation8]  }
 0x226   :  { %s230_s16 = sshll.u32 %s402_s15, 4  ;;  %s240_s18 = sshll.u32 %s403_s4, 4  ;;  %s231_s16 = int_to_ptr.vmem [resolvable:$true] %s230_s16  ;;  %s241_s18 = int_to_ptr.vmem [resolvable:$true] %s240_s18 }
 0x227   :  { %s349_s19 = scalar_lea.vmem %s231_s16, 16  ;;  %s353_s20 = scalar_lea.vmem %s231_s16, 32 }
 0x228   :  { %p350_p10 = scmp.ne.s32.totalorder %s231_s16, %s349_s19  ;;  %p354_p11 = scmp.lt.s32.totalorder %s231_s16, %s231_s16 }
 0x229   :  { %p355_p12 = scmp.lt.s32.totalorder %s353_s20, %s349_s19 }
 0x22b   :  { %p356_p13 = por %p355_p12, %p354_p11 }
 0x22d   :  { %p357_p0 = pnand %p356_p13, %p350_p10 }
 0x2a7   :  { %v182_v55 = vpop.xlane.xlu0 %181 }
 0x2a8   :  { %v183_v56 = vrot.slane %v182_v55, 4 }
 0x2aa   :  { %v184_v57 = vadd.f32 %v183_v56, %v182_v55 }
 0x2ab   :  { %v201_v58 = vpop.xlane.xlu0 %200 }
 0x2ac   :  { %v185_v59 = vrot.slane %v184_v57, 2  ;;  %v202_v60 = vrot.slane %v201_v58, 4 }
 0x2ae   :  { %v203_v61 = vadd.f32 %v202_v60, %v201_v58  ;;  %v186_v62 = vadd.f32 %v185_v59, %v184_v57 }
 0x2b0   :  { %v204_v63 = vrot.slane %v203_v61, 2  ;;  %v187_v0 = vrot.slane %v186_v62, 1 }
 0x2b2   :  { %v205_v1 = vadd.f32 %v204_v63, %v203_v61  ;;  %v188_v2 = vadd.f32 %v187_v0, %v186_v62 }
 0x2b4   :  { %284 = vpush %v188_v2  ;;  %v206_v3 = vrot.slane %v205_v1, 1 }
 0x2b6   :  { %v207_v4 = vadd.f32 %v206_v3, %v205_v1 }
 0x2b8   :  { %286 = vpush %v207_v4 }
 0x2e5   :  { %s285_s17 = spop %284 }
 0x2e6   :  { %v190_v5 = vstv %s285_s17 }
 0x2e7   :  { %192 = vst [vmem:[#allocation6] sm:$0x1] %v190_v5 }
 0x2e8   :  { %360 = shalt.err (!%p357_p0)
}
 0x2e9   :  { %233 = dma.vmem_to_hbm [thread:$0]  %s231_s16, 16, %s497_s5, [#allocation7]  }
 0x2ea   :  { %s287_s23 = spop %286  ;;  %s369_s24 = scalar_lea.vmem %s241_s18, 16 }
 0x2eb   :  { %v209_v6 = vstv %s287_s23  ;;  %p370_p1 = scmp.ne.s32.totalorder %s241_s18, %s369_s24  ;;  %s373_s25 = scalar_lea.vmem %s241_s18, 32 }
 0x2ec   :  { %211 = vst [vmem:[#allocation8] sm:$0x1] %v209_v6  ;;  %p374_p2 = scmp.lt.s32.totalorder %s241_s18, %s241_s18  ;;  %p375_p3 = scmp.lt.s32.totalorder %s373_s25, %s369_s24 }
 0x2ee   :  { %p376_p4 = por %p375_p3, %p374_p2 }
 0x2f0   :  { %p377_p5 = pnand %p376_p4, %p370_p1 }
 0x2f2   :  { %380 = shalt.err (!%p377_p5)
}
 0x2f3   :  { %243 = dma.vmem_to_hbm [thread:$0]  %s241_s18, 16, %s498_s6, [#allocation7]  }
 0x2f4   :  { %391 = dma.done.wait [#allocation4], 128  }
 0x2f5   :  { %392 = vsyncadd [#allocation4], 4294967168 }
 0x2f6   :  { %393 = dma.done.wait [#allocation7], 32  }
 0x2f7   :  { %394 = vsyncadd [#allocation7], 4294967264 }
 0x2f8   :  { %253 = vsyncpa [#allocation3], 1 }
 0x2f9   :  { %254 = vsyncpa [#allocation4], 1 }
 0x2fa   :  { %255 = vsyncpa [#allocation7], 1 }

</bundles_post_ra>
